<compile_context>
chip_gen: v6e
topology: v6e:2x2x1
jax: 0.10.0
libtpu: 0.0.40
codegen_flags: <defaults>
</compile_context>

<pallas_src>
import jax
import jax.numpy as jnp
from jax import lax
from jax.experimental import pallas as pl
from jax.experimental.pallas import tpu as pltpu

_INV_SQRT2 = 0.7071067811865476


def _gelu_exact(h):
    # PyTorch nn.GELU() default: x * 0.5 * (1 + erf(x / sqrt(2)))
    return 0.5 * h * (1.0 + lax.erf(h * _INV_SQRT2))


def _ffn_kernel(x_ref, w1_ref, b1_ref, w2_ref, b2_ref, o_ref, acc_ref):
    k = pl.program_id(1)

    @pl.when(k == 0)
    def _init():
        acc_ref[...] = jnp.zeros_like(acc_ref)

    # First matmul: native-dtype operands, fp32 accumulation on the MXU.
    h = jnp.dot(x_ref[...], w1_ref[...], preferred_element_type=jnp.float32)
    h = _gelu_exact(h + b1_ref[...])          # fp32 bias add + exact GELU
    h = h.astype(w2_ref.dtype)                # operand dtype for the 2nd MXU pass
    acc_ref[...] += jnp.dot(h, w2_ref[...], preferred_element_type=jnp.float32)

    @pl.when(k == pl.num_programs(1) - 1)
    def _finalize():
        o_ref[...] = (acc_ref[...] + b2_ref[...]).astype(o_ref.dtype)


def _pick_hidden_tile(H, target, align=128):
    """Largest multiple of `align` <= target that divides H (else H resident)."""
    if H <= target:
        return H
    t = (target // align) * align
    while t >= align:
        if H % t == 0:
            return t
        t -= align
    return H


def feedforward_forward(x, w1, b1, w2, b2, *, block_rows=256, block_hidden=512):
    """FeedForward forward pass (eval mode).

    x:  [..., D]
    w1: [D, H], b1: [H]   (first Linear, x@W layout)
    w2: [H, D], b2: [D]   (second Linear)
    """
    orig_shape = x.shape
    D = orig_shape[-1]
    H = w1.shape[1]
    assert w1.shape == (D, H) and w2.shape == (H, D)
    assert b1.shape == (H,) and b2.shape == (D,)

    xf = x.reshape(-1, D)
    N = xf.shape[0]

    # Row tile: multiple of 8 sublanes, no larger than needed.
    n_rounded = ((N + 7) // 8) * 8
    tn = max(8, min((block_rows // 8) * 8, n_rounded))
    # Hidden tile: multiple of 128 lanes that divides H (or H itself).
    tH = _pick_hidden_tile(H, block_hidden)

    grid = (pl.cdiv(N, tn), H // tH)

    # Operands stay in the activation dtype (no fp32 up-cast); biases in fp32.
    wdtype = x.dtype
    w1c = w1.astype(wdtype)
    w2c = w2.astype(wdtype)
    b1c = b1.reshape(1, H).astype(jnp.float32)
    b2c = b2.reshape(1, D).astype(jnp.float32)

    xb = jnp.dtype(x.dtype).itemsize
    wb = jnp.dtype(wdtype).itemsize

    # Per-step VMEM estimate (double-buffered streams + fp32 accumulator).
    vmem_est = (
        2 * tn * D * xb            # x tile
        + 2 * D * tH * wb          # W1 tile
        + 2 * tH * D * wb          # W2 tile
        + 2 * (tH + D) * 4         # biases
        + 2 * tn * D * xb          # output tile
        + tn * D * 4               # fp32 accumulator scratch
    )
    vmem_limit = int(min(max(int(vmem_est * 1.5), 32 * 1024 * 1024),
                         64 * 1024 * 1024))   # cap: safe on v7x's 64 MiB VMEM

    cost = pl.CostEstimate(
        flops=4 * N * D * H,                   # two N*D*H matmuls
        transcendentals=N * H,                 # erf per hidden element
        bytes_accessed=2 * N * D * xb + 2 * D * H * wb + (H + D) * 4,
    )

    out = pl.pallas_call(
        _ffn_kernel,
        out_shape=jax.ShapeDtypeStruct((N, D), x.dtype),
        grid_spec=pltpu.PrefetchScalarGridSpec(
            num_scalar_prefetch=0,
            grid=grid,
            in_specs=[
                pl.BlockSpec((tn, D), lambda i, k: (i, 0)),   # x row tile (resident over k)
                pl.BlockSpec((D, tH), lambda i, k: (0, k)),   # W1 column tile
                pl.BlockSpec((1, tH), lambda i, k: (0, k)),   # b1 tile
                pl.BlockSpec((tH, D), lambda i, k: (k, 0)),   # W2 row tile
                pl.BlockSpec((1, D), lambda i, k: (0, 0)),    # b2
            ],
            out_specs=pl.BlockSpec((tn, D), lambda i, k: (i, 0)),
            scratch_shapes=[pltpu.VMEM((tn, D), jnp.float32)],
        ),
        compiler_params=pltpu.CompilerParams(
            dimension_semantics=("parallel", "arbitrary"),
            vmem_limit_bytes=vmem_limit,
        ),
        cost_estimate=cost,
    )(xf, w1c, b1c, w2c, b2c)

    return out.reshape(orig_shape)


# TODO(synk): nn.Dropout is skipped (p=0.0 default / eval mode => identity);
# training-mode dropout would need pltpu.prng_seed + prng_random_bits masking.


def _ffn_reference(x, w1, b1, w2, b2):
    """Pure-JAX reference following the PyTorch ops literally (eval mode)."""
    h = x @ w1 + b1
    h = 0.5 * h * (1.0 + lax.erf(h * _INV_SQRT2))
    return h @ w2 + b2


if __name__ == "__main__":
    key = jax.random.PRNGKey(0)
    kx, k1, k2, k3, k4 = jax.random.split(key, 5)

    B, S, D, H = 2, 8, 16, 32          # batch, seq, dim, hidden_dim
    x = jax.random.normal(kx, (B, S, D), dtype=jnp.float32)
    w1 = jax.random.normal(k1, (D, H), dtype=jnp.float32) / jnp.sqrt(float(D))
    b1 = 0.1 * jax.random.normal(k2, (H,), dtype=jnp.float32)
    w2 = jax.random.normal(k3, (H, D), dtype=jnp.float32) / jnp.sqrt(float(H))
    b2 = 0.1 * jax.random.normal(k4, (D,), dtype=jnp.float32)

    fwd = jax.jit(feedforward_forward)
    y = fwd(x, w1, b1, w2, b2)
    jax.block_until_ready(y)
    assert y.shape == (B, S, D)

    y_ref = _ffn_reference(x, w1, b1, w2, b2)
    max_err = float(jnp.max(jnp.abs(y - y_ref)))
    # Tolerance loosened vs fp32-HIGHEST since the MXU runs native-precision
    # operand passes (still fp32 accumulation).
    assert jnp.allclose(y, y_ref, atol=3e-2, rtol=3e-2), max_err
    print("KERNEL_OK")
</pallas_src>

<mosaic_0001>
module attributes {stable_mosaic.version = 11 : i64} {
  func.func @_ffn_kernel(%arg0: i32, %arg1: i32, %arg2: memref<16x16xf32, #tpu.memory_space<vmem>>, %arg3: memref<16x32xf32, #tpu.memory_space<vmem>>, %arg4: memref<1x32xf32, #tpu.memory_space<vmem>>, %arg5: memref<32x16xf32, #tpu.memory_space<vmem>>, %arg6: memref<1x16xf32, #tpu.memory_space<vmem>>, %arg7: memref<16x16xf32, #tpu.memory_space<vmem>>, %arg8: memref<16x16xf32, #tpu.memory_space<vmem>>) attributes {dimension_semantics = [#tpu.dimension_semantics<parallel>, #tpu.dimension_semantics<arbitrary>], iteration_bounds = array<i64: 1, 1>, scalar_prefetch = 0 : i64, scratch_operands = 1 : i64, tpu.core_type = #tpu.core_type<tc>, window_params = [{transform_indices = @transform_0, window_bounds = array<i64: 16, 16>}, {transform_indices = @transform_1, window_bounds = array<i64: 16, 32>}, {transform_indices = @transform_2, window_bounds = array<i64: 1, 32>}, {transform_indices = @transform_3, window_bounds = array<i64: 32, 16>}, {pipeline_mode = #tpu.pipeline_mode<synchronous>, transform_indices = @transform_4, window_bounds = array<i64: 1, 16>}, {transform_indices = @transform_5, window_bounds = array<i64: 16, 16>}]} {
    %c0_i32 = arith.constant 0 : i32
    %0 = arith.cmpi eq, %arg1, %c0_i32 : i32
    %1 = arith.extui %0 : i1 to i32
    %c0_i32_0 = arith.constant 0 : i32
    %2 = arith.cmpi ne, %1, %c0_i32_0 : i32
    scf.if %2 {
      %cst_18 = arith.constant 0.000000e+00 : f32
      %25 = vector.broadcast %cst_18 : f32 to vector<16x16xf32>
      %c0_19 = arith.constant 0 : index
      %c0_20 = arith.constant 0 : index
      %26 = vector.load %arg8[%c0_19, %c0_20] : memref<16x16xf32, #tpu.memory_space<vmem>>, vector<16x16xf32>
      tpu.vector_store %arg8[%c0_19, %c0_20], %25 {strides = array<i32>} : memref<16x16xf32, #tpu.memory_space<vmem>>, vector<16x16xf32>,
    } else {
    }
    %c0 = arith.constant 0 : index
    %c0_1 = arith.constant 0 : index
    %3 = vector.load %arg2[%c0, %c0_1] : memref<16x16xf32, #tpu.memory_space<vmem>>, vector<16x16xf32>
    %c0_2 = arith.constant 0 : index
    %c0_3 = arith.constant 0 : index
    %4 = vector.load %arg3[%c0_2, %c0_3] : memref<16x32xf32, #tpu.memory_space<vmem>>, vector<16x32xf32>
    %cst = arith.constant dense<0.000000e+00> : vector<16x32xf32>
    %5 = tpu.matmul %3, %4, %cst {dimension_numbers = #tpu.dot_dimension_numbers<[1], [0], [0], [1], [0, 0, 1, 1], [], []>} : vector<16x16xf32>, vector<16x32xf32>, vector<16x32xf32> -> vector<16x32xf32>
    %c0_4 = arith.constant 0 : index
    %c0_5 = arith.constant 0 : index
    %6 = vector.load %arg4[%c0_4, %c0_5] : memref<1x32xf32, #tpu.memory_space<vmem>>, vector<1x32xf32>
    %7 = vector.broadcast %6 : vector<1x32xf32> to vector<16x32xf32>
    %8 = arith.addf %5, %7 : vector<16x32xf32>
    %cst_6 = arith.constant 5.000000e-01 : f32
    %9 = vector.broadcast %cst_6 : f32 to vector<16x32xf32>
    %10 = arith.mulf %9, %8 : vector<16x32xf32>
    %cst_7 = arith.constant 0.707106769 : f32
    %11 = vector.broadcast %cst_7 : f32 to vector<16x32xf32>
    %12 = arith.mulf %8, %11 : vector<16x32xf32>
    %13 = math.erf %12 : vector<16x32xf32>
    %cst_8 = arith.constant 1.000000e+00 : f32
    %14 = vector.broadcast %cst_8 : f32 to vector<16x32xf32>
    %15 = arith.addf %14, %13 : vector<16x32xf32>
    %16 = arith.mulf %10, %15 : vector<16x32xf32>
    %c0_9 = arith.constant 0 : index
    %c0_10 = arith.constant 0 : index
    %17 = vector.load %arg8[%c0_9, %c0_10] : memref<16x16xf32, #tpu.memory_space<vmem>>, vector<16x16xf32>
    %c0_11 = arith.constant 0 : index
    %c0_12 = arith.constant 0 : index
    %18 = vector.load %arg5[%c0_11, %c0_12] : memref<32x16xf32, #tpu.memory_space<vmem>>, vector<32x16xf32>
    %cst_13 = arith.constant dense<0.000000e+00> : vector<16x16xf32>
    %19 = tpu.matmul %16, %18, %cst_13 {dimension_numbers = #tpu.dot_dimension_numbers<[1], [0], [0], [1], [0, 0, 1, 1], [], []>} : vector<16x32xf32>, vector<32x16xf32>, vector<16x16xf32> -> vector<16x16xf32>
    %20 = arith.addf %17, %19 : vector<16x16xf32>
    %c0_14 = arith.constant 0 : index
    %c0_15 = arith.constant 0 : index
    %21 = vector.load %arg8[%c0_14, %c0_15] : memref<16x16xf32, #tpu.memory_space<vmem>>, vector<16x16xf32>
    tpu.vector_store %arg8[%c0_14, %c0_15], %20 {strides = array<i32>} : memref<16x16xf32, #tpu.memory_space<vmem>>, vector<16x16xf32>,
    %c0_i32_16 = arith.constant 0 : i32
    %22 = arith.cmpi eq, %arg1, %c0_i32_16 : i32
    %23 = arith.extui %22 : i1 to i32
    %c0_i32_17 = arith.constant 0 : i32
    %24 = arith.cmpi ne, %23, %c0_i32_17 : i32
    scf.if %24 {
      %c0_18 = arith.constant 0 : index
      %c0_19 = arith.constant 0 : index
      %25 = vector.load %arg8[%c0_18, %c0_19] : memref<16x16xf32, #tpu.memory_space<vmem>>, vector<16x16xf32>
      %c0_20 = arith.constant 0 : index
      %c0_21 = arith.constant 0 : index
      %26 = vector.load %arg6[%c0_20, %c0_21] : memref<1x16xf32, #tpu.memory_space<vmem>>, vector<1x16xf32>
      %27 = vector.broadcast %26 : vector<1x16xf32> to vector<16x16xf32>
      %28 = arith.addf %25, %27 : vector<16x16xf32>
      %c0_22 = arith.constant 0 : index
      %c0_23 = arith.constant 0 : index
      %29 = vector.load %arg7[%c0_22, %c0_23] : memref<16x16xf32, #tpu.memory_space<vmem>>, vector<16x16xf32>
      tpu.vector_store %arg7[%c0_22, %c0_23], %28 {strides = array<i32>} : memref<16x16xf32, #tpu.memory_space<vmem>>, vector<16x16xf32>,
    } else {
    }
    return
  }
  func.func @transform_0(%arg0: i32, %arg1: i32) -> (i32, i32) {
    %c0_i32 = arith.constant 0 : i32
    %c0_i32_0 = arith.constant 0 : i32
    return %arg0, %c0_i32 : i32, i32
  }
  func.func @transform_1(%arg0: i32, %arg1: i32) -> (i32, i32) {
    %c0_i32 = arith.constant 0 : i32
    %c0_i32_0 = arith.constant 0 : i32
    return %c0_i32, %arg1 : i32, i32
  }
  func.func @transform_2(%arg0: i32, %arg1: i32) -> (i32, i32) {
    %c0_i32 = arith.constant 0 : i32
    %c0_i32_0 = arith.constant 0 : i32
    return %c0_i32, %arg1 : i32, i32
  }
  func.func @transform_3(%arg0: i32, %arg1: i32) -> (i32, i32) {
    %c0_i32 = arith.constant 0 : i32
    %c0_i32_0 = arith.constant 0 : i32
    return %arg1, %c0_i32 : i32, i32
  }
  func.func @transform_4(%arg0: i32, %arg1: i32) -> (i32, i32) {
    %c0_i32 = arith.constant 0 : i32
    %c0_i32_0 = arith.constant 0 : i32
    %c0_i32_1 = arith.constant 0 : i32
    return %c0_i32, %c0_i32_0 : i32, i32
  }
  func.func @transform_5(%arg0: i32, %arg1: i32) -> (i32, i32) {
    %c0_i32 = arith.constant 0 : i32
    %c0_i32_0 = arith.constant 0 : i32
    return %arg0, %c0_i32 : i32, i32
  }
}

</mosaic_0001>

<bundles_post_ra>
// kernel: feedforward_forward.1
= control target key start
LH: loop header
LB: loop body
LE: loop exit
PB: predicated region body
PF: predicated region fallthrough
CT: control target
= control target key end

     0   :  { %vm25_vm0 = vcmask 130048   ;;  %s394_s0 = inlined_call_operand.vmem [shape: f32[16,16], index: 0, kind: input, shape index: {}]   ;;  %s395_s1 = inlined_call_operand.vmem [shape: f32[16,32], index: 1, kind: input, shape index: {}]   ;;  %s396_s2 = inlined_call_operand.vmem [shape: f32[1,32], index: 2, kind: input, shape index: {}]   ;;  %s397_s3 = inlined_call_operand.vmem [shape: f32[32,16], index: 3, kind: input, shape index: {}]   ;;  %s398_s4 = inlined_call_operand.vmem [shape: f32[1,16], index: 4, kind: input, shape index: {}]   ;;  %s399_s5 = inlined_call_operand.hbm [shape: f32[16,16], index: 5, kind: output, shape index: {}]  }
   0x1   :  { %v31_v0 = vld [vmem:[%s395_s1 + $0x8] sm:$0xff]  ;;  %v30_v1 = vld [vmem:[%s395_s1] sm:$0xff] }
   0x2   :  { %v28_v2 = vld [vmem:[%s394_s0] sm:$0xff]  ;;  %271 = vmatprep.subr.mxu0 %v31_v0 }
   0x3   :  { %275 = vmatprep.mubr.msk.f32.mxu0 %vm25_vm0, %v28_v2 }
   0x4   :  { %10 = vsyncpa [#allocation4], 0  ;;  %272 = vmatpush3.msra.mxu0 %v31_v0  ;;  %v29_v3 = vld [vmem:[%s394_s0 + $0x8] sm:$0xff]  ;;  %v136_v4 = vld [vmem:[%s397_s3 + $0x18] sm:$0xff]  ;;  %v319_v8 = vmov 0.0   ;;  %vm137_vm1 = vcmask 261120  }
   0x5   :  { %273 = vmatprep.subr.mxu0 %v30_v1  ;;  %278 = vmatprep.subr.mxu1 %v136_v4  ;;  %v135_v5 = vld [vmem:[%s397_s3 + $0x10] sm:$0xff]  ;;  %v134_v6 = vld [vmem:[%s397_s3 + $0x8] sm:$0xff]  ;;  %v133_v7 = vld [vmem:[%s397_s3] sm:$0xff]  ;;  %27 = vst.msk [vmem:[#allocation2 + $0x8] sm:$0xff] %vm25_vm0, %v319_v8  ;;  %s320_s9 = smov [#allocation3]  }
   0x6   :  { %274 = vmatpush3.msra.mxu0 %v30_v1  ;;  %279 = vmatpush3.msra.mxu1 %v136_v4  ;;  %26 = vst.msk [vmem:[#allocation2] sm:$0xff] %vm25_vm0, %v319_v8  ;;  %v255_v9 = vld [vmem:[%s396_s2] ss:$0 sm:$0xff]  ;;  %s244_s10 = sshll.u32 %s320_s9, 4  ;;  %s245_s10 = int_to_ptr.vmem [resolvable:$true] %s244_s10 }
   0x7   :  { %276 = vmatmul.mubr.msk.f32.vlgmr.msra.gmra.mxu0 %vm25_vm0, %v29_v3  ;;  %280 = vmatprep.subr.mxu1 %v135_v5  ;;  %v260_v30 = vld [vmem:[%s398_s4] ss:$0 sm:$0xff]  ;;  %s297_s11 = scalar_lea.vmem %s245_s10, 256  ;;  %p302_p1 = scmp.lt.s32.totalorder %s245_s10, %s245_s10 }
   0x8   :  { %281 = vmatpush3.msra.mxu1 %v135_v5  ;;  %p298_p0 = scmp.ne.s32.totalorder %s245_s10, %s297_s11  ;;  %p303_p2 = scmp.lt.s32.totalorder %s297_s11, %s297_s11 }
   0x9   :  { %282 = vmatprep.subr.mxu1 %v134_v6 }
   0xa   :  { %283 = vmatpush3.msra.mxu1 %v134_v6  ;;  %p304_p3 = por %p303_p2, %p302_p1 }
   0xb   :  { %284 = vmatprep.subr.mxu1 %v133_v7 }
   0xc   :  { %285 = vmatpush3.msra.mxu1 %v133_v7  ;;  %v132_v24 = vld [vmem:[#allocation2 + $0x8] sm:$0xff]  ;;  %p305_p4 = pnand %p304_p3, %p298_p0 }
   0xd   :  { %v131_v26 = vld [vmem:[#allocation2] sm:$0xff] }
  0xc7   :  { %v277_v10 = vpop.f32.mrf.mxu0 }
  0xc8   :  { %v118_v11 = vadd.f32 %v277_v10, %v255_v9 }
  0xc9   :  { %v112_v12 = vpop.f32.mrf.mxu0 }
  0xca   :  { %v124_v13 = vmul.f32 0.70710677, %v118_v11  ;;  %v113_v14 = vadd.f32 %v255_v9, %v112_v12  ;;  %v122_v21 = vmul.f32 0.5, %v118_v11 }
  0xcc   :  { %293 = verf.f32 %v124_v13  ;;  %v123_v15 = vmul.f32 0.70710677, %v113_v14  ;;  %v121_v19 = vmul.f32 0.5, %v113_v14 }
  0xce   :  { %295 = verf.f32 %v123_v15 }
  0xd9   :  { %v294_v16 = vpop.eup %293 }
  0xda   :  { %v128_v18 = vadd.f32 1.0, %v294_v16 }
  0xdb   :  { %v296_v17 = vpop.eup %295 }
  0xdc   :  { %v127_v20 = vadd.f32 1.0, %v296_v17  ;;  %v130_v23 = vmul.f32 %v128_v18, %v122_v21 }
  0xde   :  { %v129_v22 = vmul.f32 %v127_v20, %v121_v19 }
  0xe0   :  { %286 = vmatprep.mubr.msk.f32.mxu1 %vm137_vm1, %v129_v22 }
  0xe1   :  { %287 = vmatmul.mubr.msk.f32.vlgmr.msra.gmra.mxu1 %vm137_vm1, %v130_v23 }
 0x1a1   :  { %v288_v25 = vpop.f32.mrf.mxu1 }
 0x1a2   :  { %v220_v27 = vadd.f32 %v288_v25, %v132_v24 }
 0x1a3   :  { %v210_v28 = vpop.f32.mrf.mxu1 }
 0x1a4   :  { %222 = vst.msk [vmem:[#allocation2 + $0x8] sm:$0xff] %vm25_vm0, %v220_v27  ;;  %v219_v29 = vadd.f32 %v210_v28, %v131_v26 }
 0x1a6   :  { %221 = vst.msk [vmem:[#allocation2] sm:$0xff] %vm25_vm0, %v219_v29 }
 0x1ab   :  { %v227_v31 = vld [vmem:[#allocation2 + $0x8] sm:$0xff] }
 0x1ac   :  { %v236_v32 = vadd.f32 %v260_v30, %v227_v31 }
 0x1ad   :  { %v226_v33 = vld [vmem:[#allocation2] sm:$0xff] }
 0x1ae   :  { %v235_v34 = vadd.f32 %v260_v30, %v226_v33  ;;  %238 = vst.msk [vmem:[#allocation3 + $0x8] sm:$0xff] %vm25_vm0, %v236_v32 }
 0x1b0   :  { %237 = vst.msk [vmem:[#allocation3] sm:$0xff] %vm25_vm0, %v235_v34 }
 0x1b1   :  { %308 = shalt.err (!%p305_p4)
}
 0x1b2   :  { %s321_s12 = smov 128   ;;  %s322_s4 = smov 8  }
 0x1b3   :  { %250 = dma.vmem_to_hbm [thread:$0]  %s245_s10, 256, %s399_s5, [#allocation4], %s321_s12, %s321_s12, %s322_s4  }
 0x1b4   :  { %317 = dma.done.wait [#allocation4], 256  }
 0x1b5   :  { %318 = vsyncadd [#allocation4], 4294967040 }
 0x1b6   :  { %254 = vsyncpa [#allocation4], 1 }

</bundles_post_ra>
